<compile_context>
chip_gen: v5e
topology: v5e:2x2
jax: 0.10.0
libtpu: 0.0.40
codegen_flags: <defaults>
</compile_context>

<pallas_src>
import functools

import jax
import jax.numpy as jnp
from jax.experimental import pallas as pl
from jax.experimental.pallas import tpu as pltpu


def _mlp_kernel(x_ref, w1_ref, b1_ref, w2_ref, b2_ref, w3_ref, b3_ref, o_ref):
    # Cast x to the matmul operand dtype (bf16 by default) *inside* the kernel:
    # cheaper than a wrapper-side XLA cast pass over x in HBM and hidden under
    # the MXU work.
    x = x_ref[...].astype(w1_ref.dtype)
    # fc1 / fc2 on the MXU with f32 accumulation; biases & activations in f32.
    h1 = jnp.dot(x, w1_ref[...], preferred_element_type=jnp.float32) + b1_ref[...]
    h1 = jnp.maximum(h1, 0.0).astype(w2_ref.dtype)
    h2 = jnp.dot(h1, w2_ref[...], preferred_element_type=jnp.float32) + b2_ref[...]
    h2 = jnp.maximum(h2, 0.0)
    # fc3: contract h2's hidden dim (bt, H2) with the single weight row (1, H2)
    # -> lane-dense (1, bt) logits (batch on lanes): plain dense row store, no
    # masked width-1 column stores, no MXU pass wasted on a single output col.
    logit = jax.lax.dot_general(
        w3_ref[...], h2,
        dimension_numbers=(((1,), (1,)), ((), ())),
        preferred_element_type=jnp.float32,
    ) + b3_ref[...]
    # Sigmoid epilogue: exp on the EUP, divide routed to the EUP reciprocal.
    o_ref[...] = pl.reciprocal(1.0 + jnp.exp(-logit), approx=True).astype(o_ref.dtype)


def _round_up(n, m):
    return ((n + m - 1) // m) * m


def _cdiv(a, b):
    return -(-a // b)


def _choose_batch_tile(B, batch_tile):
    """Pick the batch tile (no wrapper padding; ragged last tile is allowed)."""
    if B <= 256:
        # Single tile covering the whole small batch: block dims equal the full
        # array dims, so the (8,128) rule is satisfied without padding.
        return B
    # Lane-aligned tiles (multiple of 256) keep the x tile and the lane-dense
    # (1, bt) output row dense; the ragged last tile is handled by Pallas'
    # partial-block DMA masking.
    bt = min(_round_up(batch_tile, 256), _round_up(B, 256))
    # v7x has 2 TensorCores: make sure the "parallel" grid axis has >= 2 tiles
    # so both cores get work (~2x there for free, negligible cost elsewhere).
    while bt > 256 and _cdiv(B, bt) < 2:
        bt = max(256, _round_up(bt // 2, 256))
    return bt


@functools.partial(jax.jit, static_argnames=("batch_tile", "compute_dtype"))
def net_forward(x, params, batch_tile=1024, compute_dtype=jnp.bfloat16):
    """x: [B, 2*embedding_dim]. Returns sigmoid(fc3(relu(fc2(relu(fc1(x)))))) as (B,)."""
    w1, b1, w2, b2, w3, b3 = params
    B, Din = x.shape
    H1 = w1.shape[1]   # 512
    H2 = w2.shape[1]   # 128

    bt = _choose_batch_tile(B, batch_tile)
    num_tiles = _cdiv(B, bt)

    # Matmul weights in compute_dtype (bf16 by default: all MXUs are bf16-native,
    # and it halves the resident-weight VMEM).  Biases and the tiny fc3 weight
    # row stay f32 and feed the f32 accumulators.  x itself is NOT touched here
    # (cast happens in-kernel) to avoid an extra HBM pass over the batch.
    w1c = w1.astype(compute_dtype)
    w2c = w2.astype(compute_dtype)
    w3r = w3.reshape(1, H2).astype(jnp.float32)
    b1f = b1.reshape(1, H1).astype(jnp.float32)
    b2f = b2.reshape(1, H2).astype(jnp.float32)
    b3f = b3.reshape(1, 1).astype(jnp.float32)

    w_itemsize = jnp.dtype(compute_dtype).itemsize
    cost = pl.CostEstimate(
        flops=2 * B * (Din * H1 + H1 * H2 + H2),
        transcendentals=B,
        bytes_accessed=(B * Din * x.dtype.itemsize            # x (read as-is)
                        + (Din * H1 + H1 * H2) * w_itemsize    # w1, w2
                        + (H1 + H2 + H2 + 1) * 4               # biases + w3 row
                        + B * 4),                              # output
    )

    out = pl.pallas_call(
        _mlp_kernel,
        out_shape=jax.ShapeDtypeStruct((1, B), jnp.float32),
        grid_spec=pltpu.PrefetchScalarGridSpec(
            num_scalar_prefetch=0,
            grid=(num_tiles,),
            in_specs=[
                pl.BlockSpec((bt, Din), lambda i: (i, 0)),  # x tile (ragged tail ok)
                pl.BlockSpec((Din, H1), lambda i: (0, 0)),  # w1 (resident)
                pl.BlockSpec((1, H1), lambda i: (0, 0)),    # b1
                pl.BlockSpec((H1, H2), lambda i: (0, 0)),   # w2 (resident)
                pl.BlockSpec((1, H2), lambda i: (0, 0)),    # b2
                pl.BlockSpec((1, H2), lambda i: (0, 0)),    # w3 (row)
                pl.BlockSpec((1, 1), lambda i: (0, 0)),     # b3
            ],
            out_specs=pl.BlockSpec((1, bt), lambda i: (0, i)),  # lane-dense row
        ),
        compiler_params=pltpu.CompilerParams(
            dimension_semantics=("parallel",),
            # Explicit scoped-VMEM limit so v5e's 16 MiB default never forces a
            # smaller tile; ~6 MB needed at bt=1024, ~10 MB at bt=2048.
            vmem_limit_bytes=32 * 1024 * 1024,
        ),
        cost_estimate=cost,
    )(x, w1c, b1f, w2c, b2f, w3r, b3f)

    # .squeeze() like PyTorch: drop the singleton output dim.
    return out.reshape(-1)


def init_params(key, embedding_dim):
    """Deterministic PyTorch-style init: U(-1/sqrt(fan_in), 1/sqrt(fan_in)).

    Weights stored as (in, out) = PyTorch weight transposed.
    """
    dims = [(2 * embedding_dim, 512), (512, 128), (128, 1)]
    params = []
    for (fan_in, fan_out) in dims:
        key, kw, kb = jax.random.split(key, 3)
        bound = 1.0 / jnp.sqrt(jnp.float32(fan_in))
        w = jax.random.uniform(kw, (fan_in, fan_out), jnp.float32, -bound, bound)
        b = jax.random.uniform(kb, (1, fan_out), jnp.float32, -bound, bound)
        params.extend([w, b])
    return tuple(params)


def _reference_forward(x, params):
    w1, b1, w2, b2, w3, b3 = params
    h = jnp.maximum(x @ w1 + b1, 0.0)
    h = jnp.maximum(h @ w2 + b2, 0.0)
    logit = h @ w3 + b3
    return jnp.squeeze(jax.nn.sigmoid(logit), axis=-1)


if __name__ == "__main__":
    embedding_dim = 64              # input features = 2 * 64 = 128 (lane-aligned)
    params = init_params(jax.random.PRNGKey(0), embedding_dim)

    # 1) tiny batch, f32 operands, single-tile path (bt == B)
    x1 = jax.random.normal(jax.random.PRNGKey(0), (8, 2 * embedding_dim), jnp.float32)
    y1 = jax.block_until_ready(net_forward(x1, params, compute_dtype=jnp.float32))
    y1_ref = _reference_forward(x1, params)
    assert y1.shape == (8,), y1.shape
    # approx EUP reciprocal in the sigmoid -> tolerance a bit above 1e-4
    assert jnp.allclose(y1, y1_ref, atol=5e-3, rtol=5e-3), "f32 single-tile mismatch"

    # 2) multi-tile path with a ragged last tile, default bf16 operands
    x2 = jax.random.normal(jax.random.PRNGKey(1), (300, 2 * embedding_dim), jnp.float32)
    y2 = jax.block_until_ready(net_forward(x2, params))
    y2_ref = _reference_forward(x2, params)
    assert y2.shape == (300,), y2.shape
    assert jnp.max(jnp.abs(y2 - y2_ref)) < 5e-2, "bf16 multi-tile mismatch"

    # 3) multi-tile ragged path, f32 operands (exercises partial-block masking
    #    without padding at tight tolerance)
    y3 = jax.block_until_ready(
        net_forward(x2, params, batch_tile=256, compute_dtype=jnp.float32))
    assert y3.shape == (300,)
    assert jnp.allclose(y3, y2_ref, atol=5e-3, rtol=5e-3), "f32 multi-tile mismatch"

    print("KERNEL_OK")
</pallas_src>

<mosaic_0001>
module attributes {stable_mosaic.version = 11 : i64} {
  func.func @_mlp_kernel(%arg0: i32, %arg1: memref<8x128xf32, #tpu.memory_space<vmem>>, %arg2: memref<128x512xf32, #tpu.memory_space<vmem>>, %arg3: memref<1x512xf32, #tpu.memory_space<vmem>>, %arg4: memref<512x128xf32, #tpu.memory_space<vmem>>, %arg5: memref<1x128xf32, #tpu.memory_space<vmem>>, %arg6: memref<1x128xf32, #tpu.memory_space<vmem>>, %arg7: memref<1x1xf32, #tpu.memory_space<vmem>>, %arg8: memref<1x8xf32, #tpu.memory_space<vmem>>) attributes {dimension_semantics = [#tpu.dimension_semantics<parallel>], iteration_bounds = array<i64: 1>, scalar_prefetch = 0 : i64, scratch_operands = 0 : i64, tpu.core_type = #tpu.core_type<tc>, window_params = [{transform_indices = @transform_0, window_bounds = array<i64: 8, 128>}, {pipeline_mode = #tpu.pipeline_mode<synchronous>, transform_indices = @transform_1, window_bounds = array<i64: 128, 512>}, {pipeline_mode = #tpu.pipeline_mode<synchronous>, transform_indices = @transform_2, window_bounds = array<i64: 1, 512>}, {pipeline_mode = #tpu.pipeline_mode<synchronous>, transform_indices = @transform_3, window_bounds = array<i64: 512, 128>}, {pipeline_mode = #tpu.pipeline_mode<synchronous>, transform_indices = @transform_4, window_bounds = array<i64: 1, 128>}, {pipeline_mode = #tpu.pipeline_mode<synchronous>, transform_indices = @transform_5, window_bounds = array<i64: 1, 128>}, {pipeline_mode = #tpu.pipeline_mode<synchronous>, transform_indices = @transform_6, window_bounds = array<i64: 1, 1>}, {transform_indices = @transform_7, window_bounds = array<i64: 1, 8>}]} {
    %c0 = arith.constant 0 : index
    %c0_0 = arith.constant 0 : index
    %0 = vector.load %arg1[%c0, %c0_0] : memref<8x128xf32, #tpu.memory_space<vmem>>, vector<8x128xf32>
    %c0_1 = arith.constant 0 : index
    %c0_2 = arith.constant 0 : index
    %1 = vector.load %arg2[%c0_1, %c0_2] : memref<128x512xf32, #tpu.memory_space<vmem>>, vector<128x512xf32>
    %cst = arith.constant dense<0.000000e+00> : vector<8x512xf32>
    %2 = tpu.matmul %0, %1, %cst {dimension_numbers = #tpu.dot_dimension_numbers<[1], [0], [0], [1], [0, 0, 1, 1], [], []>} : vector<8x128xf32>, vector<128x512xf32>, vector<8x512xf32> -> vector<8x512xf32>
    %c0_3 = arith.constant 0 : index
    %c0_4 = arith.constant 0 : index
    %3 = vector.load %arg3[%c0_3, %c0_4] : memref<1x512xf32, #tpu.memory_space<vmem>>, vector<1x512xf32>
    %4 = vector.broadcast %3 : vector<1x512xf32> to vector<8x512xf32>
    %5 = arith.addf %2, %4 : vector<8x512xf32>
    %cst_5 = arith.constant 0.000000e+00 : f32
    %6 = vector.broadcast %cst_5 : f32 to vector<8x512xf32>
    %7 = arith.maximumf %5, %6 : vector<8x512xf32>
    %c0_6 = arith.constant 0 : index
    %c0_7 = arith.constant 0 : index
    %8 = vector.load %arg4[%c0_6, %c0_7] : memref<512x128xf32, #tpu.memory_space<vmem>>, vector<512x128xf32>
    %cst_8 = arith.constant dense<0.000000e+00> : vector<8x128xf32>
    %9 = tpu.matmul %7, %8, %cst_8 {dimension_numbers = #tpu.dot_dimension_numbers<[1], [0], [0], [1], [0, 0, 1, 1], [], []>} : vector<8x512xf32>, vector<512x128xf32>, vector<8x128xf32> -> vector<8x128xf32>
    %c0_9 = arith.constant 0 : index
    %c0_10 = arith.constant 0 : index
    %10 = vector.load %arg5[%c0_9, %c0_10] : memref<1x128xf32, #tpu.memory_space<vmem>>, vector<1x128xf32>
    %11 = vector.broadcast %10 : vector<1x128xf32> to vector<8x128xf32>
    %12 = arith.addf %9, %11 : vector<8x128xf32>
    %cst_11 = arith.constant 0.000000e+00 : f32
    %13 = vector.broadcast %cst_11 : f32 to vector<8x128xf32>
    %14 = arith.maximumf %12, %13 : vector<8x128xf32>
    %c0_12 = arith.constant 0 : index
    %c0_13 = arith.constant 0 : index
    %15 = vector.load %arg6[%c0_12, %c0_13] : memref<1x128xf32, #tpu.memory_space<vmem>>, vector<1x128xf32>
    %cst_14 = arith.constant dense<0.000000e+00> : vector<1x8xf32>
    %16 = tpu.matmul %15, %14, %cst_14 {dimension_numbers = #tpu.dot_dimension_numbers<[1], [1], [0], [0], [0, 0, 1, 0], [], []>} : vector<1x128xf32>, vector<8x128xf32>, vector<1x8xf32> -> vector<1x8xf32>
    %c0_15 = arith.constant 0 : index
    %c0_16 = arith.constant 0 : index
    %17 = vector.load %arg7[%c0_15, %c0_16] : memref<1x1xf32, #tpu.memory_space<vmem>>, vector<1x1xf32>
    %18 = vector.broadcast %17 : vector<1x1xf32> to vector<1x8xf32>
    %19 = arith.addf %16, %18 : vector<1x8xf32>
    %cst_17 = arith.constant 0.000000e+00 : f32
    %20 = vector.broadcast %cst_17 : f32 to vector<1x8xf32>
    %21 = arith.subf %20, %19 : vector<1x8xf32>
    %22 = math.exp %21 : vector<1x8xf32>
    %cst_18 = arith.constant 1.000000e+00 : f32
    %23 = vector.broadcast %cst_18 : f32 to vector<1x8xf32>
    %24 = arith.addf %23, %22 : vector<1x8xf32>
    %25 = tpu.reciprocal %24 {approx = true} : vector<1x8xf32> -> vector<1x8xf32>
    %c0_19 = arith.constant 0 : index
    %c0_20 = arith.constant 0 : index
    %26 = vector.load %arg8[%c0_19, %c0_20] : memref<1x8xf32, #tpu.memory_space<vmem>>, vector<1x8xf32>
    tpu.vector_store %arg8[%c0_19, %c0_20], %25 {strides = array<i32>} : memref<1x8xf32, #tpu.memory_space<vmem>>, vector<1x8xf32>,
    return
  }
  func.func @transform_0(%arg0: i32) -> (i32, i32) {
    %c0_i32 = arith.constant 0 : i32
    %c0_i32_0 = arith.constant 0 : i32
    return %arg0, %c0_i32 : i32, i32
  }
  func.func @transform_1(%arg0: i32) -> (i32, i32) {
    %c0_i32 = arith.constant 0 : i32
    %c0_i32_0 = arith.constant 0 : i32
    %c0_i32_1 = arith.constant 0 : i32
    return %c0_i32, %c0_i32_0 : i32, i32
  }
  func.func @transform_2(%arg0: i32) -> (i32, i32) {
    %c0_i32 = arith.constant 0 : i32
    %c0_i32_0 = arith.constant 0 : i32
    %c0_i32_1 = arith.constant 0 : i32
    return %c0_i32, %c0_i32_0 : i32, i32
  }
  func.func @transform_3(%arg0: i32) -> (i32, i32) {
    %c0_i32 = arith.constant 0 : i32
    %c0_i32_0 = arith.constant 0 : i32
    %c0_i32_1 = arith.constant 0 : i32
    return %c0_i32, %c0_i32_0 : i32, i32
  }
  func.func @transform_4(%arg0: i32) -> (i32, i32) {
    %c0_i32 = arith.constant 0 : i32
    %c0_i32_0 = arith.constant 0 : i32
    %c0_i32_1 = arith.constant 0 : i32
    return %c0_i32, %c0_i32_0 : i32, i32
  }
  func.func @transform_5(%arg0: i32) -> (i32, i32) {
    %c0_i32 = arith.constant 0 : i32
    %c0_i32_0 = arith.constant 0 : i32
    %c0_i32_1 = arith.constant 0 : i32
    return %c0_i32, %c0_i32_0 : i32, i32
  }
  func.func @transform_6(%arg0: i32) -> (i32, i32) {
    %c0_i32 = arith.constant 0 : i32
    %c0_i32_0 = arith.constant 0 : i32
    %c0_i32_1 = arith.constant 0 : i32
    return %c0_i32, %c0_i32_0 : i32, i32
  }
  func.func @transform_7(%arg0: i32) -> (i32, i32) {
    %c0_i32 = arith.constant 0 : i32
    %c0_i32_0 = arith.constant 0 : i32
    return %c0_i32, %arg0 : i32, i32
  }
}

</mosaic_0001>

<bundles_post_ra>
// kernel: net_forward.1
= control target key start
LH: loop header
LB: loop body
LE: loop exit
PB: predicated region body
PF: predicated region fallthrough
CT: control target
= control target key end

     0   :  { %s625_s0 = inlined_call_operand.hbm [shape: f32[8,128], index: 0, kind: input, shape index: {}]   ;;  %s626_s1 = inlined_call_operand.hbm [shape: f32[128,512], index: 1, kind: input, shape index: {}]   ;;  %s627_s2 = inlined_call_operand.vmem [shape: f32[1,512], index: 2, kind: input, shape index: {}]   ;;  %s628_s3 = inlined_call_operand.hbm [shape: f32[512,128], index: 3, kind: input, shape index: {}]   ;;  %s629_s4 = inlined_call_operand.vmem [shape: f32[1,128], index: 4, kind: input, shape index: {}]   ;;  %s630_s5 = inlined_call_operand.vmem [shape: f32[1,128], index: 5, kind: input, shape index: {}]   ;;  %s631_s6 = inlined_call_operand.<no memory space> [shape: f32[1,1], index: 6, kind: input, shape index: {}]   ;;  %s632_s7 = inlined_call_operand.hbm [shape: f32[1,8], index: 7, kind: output, shape index: {}]  }
   0x1   :  { %v12_v0 = vstv %s631_s6 }
   0x2   :  { %13 = vst [vmem:[#allocation2] sm:$0x1] %v12_v0 }
   0x3   :  { %14 = vsyncpa [#allocation4], 0 }
   0x4   :  { %15 = vsyncpa [#allocation7], 0  ;;  %s32_s28 = sshll.u32 %s626_s1, 4  ;;  %s33_s28 = int_to_ptr.hbm [resolvable:$true] %s32_s28 }
   0x5   :  { %16 = vsyncpa [#allocation5], 0  ;;  %s552_s29 = smov [#allocation6]   ;;  %s22_s10 = sshll.u32 %s625_s0, 4  ;;  %s23_s10 = int_to_ptr.hbm [resolvable:$true] %s22_s10 }
   0x6   :  { %s34_s30 = sshll.u32 %s552_s29, 4  ;;  %s553_s11 = smov 512   ;;  %s35_s30 = int_to_ptr.vmem [resolvable:$true] %s34_s30 }
   0x7   :  { %s554_s12 = smov 32   ;;  %s555_s6 = smov [#allocation3]  }
   0x8   :  { %40 = dma.hbm_to_vmem [thread:$0]  %s33_s28, 8192, %s35_s30, [#allocation7], %s553_s11, %s553_s11, %s554_s12  }
   0x9   :  { %s24_s13 = sshll.u32 %s555_s6, 4  ;;  %s47_s16 = sshll.u32 %s628_s3, 4  ;;  %s25_s13 = int_to_ptr.vmem [resolvable:$true] %s24_s13  ;;  %s48_s16 = int_to_ptr.hbm [resolvable:$true] %s47_s16 }
   0xa   :  { %27 = dma.hbm_to_vmem [thread:$0]  %s23_s10, 128, %s25_s13, [#allocation4]  }
   0xb   :  { %s556_s1 = smov [#allocation8]   ;;  %s557_s18 = smov 128  }
   0xc   :  { %s49_s17 = sshll.u32 %s556_s1, 4  ;;  %s558_s19 = smov 8   ;;  %s50_s17 = int_to_ptr.vmem [resolvable:$true] %s49_s17 }
   0xd   :  { %55 = dma.hbm_to_vmem [thread:$0]  %s48_s16, 8192, %s50_s17, [#allocation7], %s557_s18, %s557_s18, %s558_s19  }
   0xe   :  { %546 = dma.done.wait [#allocation4], 128  }
   0xf   :  { %547 = vsyncadd [#allocation4], 4294967168 }
  0x10   :  { %548 = dma.done.wait [#allocation7], 16384  }
  0x11   :  { %549 = vsyncadd [#allocation7], 4294950912  ;;  %v137_v1 = vld [vmem:[#allocation6 + $0x1f0] sm:$0xff]  ;;  %v138_v3 = vld [vmem:[#allocation6 + $0x1f8] sm:$0xff]  ;;  %s424_s26 = sshll.u32 %s632_s7, 4  ;;  %vm415_vm0 = vcmask 57344   ;;  %s425_s26 = int_to_ptr.hbm [resolvable:$true] %s424_s26 }
  0x12   :  { %v133_v2 = vld [vmem:[#allocation6 + $0x1d0] sm:$0xff]  ;;  %189 = vmatpush.msra.mxu2 %v137_v1  ;;  %209 = vmatpush.msra.mxu3 %v138_v3  ;;  %v134_v4 = vld [vmem:[#allocation6 + $0x1d8] sm:$0xff]  ;;  %v135_v7 = vld [vmem:[#allocation6 + $0x1e0] sm:$0xff] }
  0x13   :  { %v129_v5 = vld [vmem:[#allocation6 + $0x1b0] sm:$0xff]  ;;  %v130_v6 = vld [vmem:[#allocation6 + $0x1b8] sm:$0xff]  ;;  %v131_v8 = vld [vmem:[#allocation6 + $0x1c0] sm:$0xff]  ;;  %149 = vmatpush.msra.mxu0 %v135_v7 }
  0x14   :  { %190 = vmatpush.msra.mxu2 %v133_v2  ;;  %210 = vmatpush.msra.mxu3 %v134_v4  ;;  %v136_v9 = vld [vmem:[#allocation6 + $0x1e8] sm:$0xff]  ;;  %v125_v10 = vld [vmem:[#allocation6 + $0x190] sm:$0xff]  ;;  %v126_v11 = vld [vmem:[#allocation6 + $0x198] sm:$0xff] }
  0x15   :  { %169 = vmatpush.msra.mxu1 %v136_v9  ;;  %v127_v12 = vld [vmem:[#allocation6 + $0x1a0] sm:$0xff]  ;;  %v132_v13 = vld [vmem:[#allocation6 + $0x1c8] sm:$0xff]  ;;  %v121_v14 = vld [vmem:[#allocation6 + $0x170] sm:$0xff]  ;;  %150 = vmatpush.msra.mxu0 %v131_v8 }
  0x16   :  { %191 = vmatpush.msra.mxu2 %v129_v5  ;;  %211 = vmatpush.msra.mxu3 %v130_v6  ;;  %v122_v15 = vld [vmem:[#allocation6 + $0x178] sm:$0xff]  ;;  %v128_v16 = vld [vmem:[#allocation6 + $0x1a8] sm:$0xff]  ;;  %v123_v17 = vld [vmem:[#allocation6 + $0x180] sm:$0xff] }
  0x17   :  { %170 = vmatpush.msra.mxu1 %v132_v13  ;;  %v124_v18 = vld [vmem:[#allocation6 + $0x188] sm:$0xff]  ;;  %v117_v19 = vld [vmem:[#allocation6 + $0x150] sm:$0xff]  ;;  %151 = vmatpush.msra.mxu0 %v127_v12  ;;  %v118_v20 = vld [vmem:[#allocation6 + $0x158] sm:$0xff] }
  0x18   :  { %192 = vmatpush.msra.mxu2 %v125_v10  ;;  %212 = vmatpush.msra.mxu3 %v126_v11  ;;  %v119_v21 = vld [vmem:[#allocation6 + $0x160] sm:$0xff]  ;;  %v120_v22 = vld [vmem:[#allocation6 + $0x168] sm:$0xff]  ;;  %v113_v23 = vld [vmem:[#allocation6 + $0x130] sm:$0xff] }
  0x19   :  { %171 = vmatpush.msra.mxu1 %v128_v16  ;;  %152 = vmatpush.msra.mxu0 %v123_v17  ;;  %v114_v24 = vld [vmem:[#allocation6 + $0x138] sm:$0xff]  ;;  %v115_v25 = vld [vmem:[#allocation6 + $0x140] sm:$0xff]  ;;  %v116_v26 = vld [vmem:[#allocation6 + $0x148] sm:$0xff] }
  0x1a   :  { %193 = vmatpush.msra.mxu2 %v121_v14  ;;  %213 = vmatpush.msra.mxu3 %v122_v15  ;;  %v109_v27 = vld [vmem:[#allocation6 + $0x110] sm:$0xff]  ;;  %v110_v28 = vld [vmem:[#allocation6 + $0x118] sm:$0xff]  ;;  %v111_v29 = vld [vmem:[#allocation6 + $0x120] sm:$0xff] }
  0x1b   :  { %172 = vmatpush.msra.mxu1 %v124_v18  ;;  %153 = vmatpush.msra.mxu0 %v119_v21  ;;  %v112_v30 = vld [vmem:[#allocation6 + $0x128] sm:$0xff]  ;;  %v105_v31 = vld [vmem:[#allocation6 + $0xf0] sm:$0xff]  ;;  %v106_v32 = vld [vmem:[#allocation6 + $0xf8] sm:$0xff] }
  0x1c   :  { %194 = vmatpush.msra.mxu2 %v117_v19  ;;  %214 = vmatpush.msra.mxu3 %v118_v20  ;;  %v107_v33 = vld [vmem:[#allocation6 + $0x100] sm:$0xff]  ;;  %v108_v34 = vld [vmem:[#allocation6 + $0x108] sm:$0xff]  ;;  %v101_v35 = vld [vmem:[#allocation6 + $0xd0] sm:$0xff] }
  0x1d   :  { %173 = vmatpush.msra.mxu1 %v120_v22  ;;  %154 = vmatpush.msra.mxu0 %v115_v25  ;;  %v102_v36 = vld [vmem:[#allocation6 + $0xd8] sm:$0xff]  ;;  %v103_v37 = vld [vmem:[#allocation6 + $0xe0] sm:$0xff]  ;;  %v104_v38 = vld [vmem:[#allocation6 + $0xe8] sm:$0xff] }
  0x1e   :  { %195 = vmatpush.msra.mxu2 %v113_v23  ;;  %215 = vmatpush.msra.mxu3 %v114_v24  ;;  %v97_v39 = vld [vmem:[#allocation6 + $0xb0] sm:$0xff]  ;;  %v98_v40 = vld [vmem:[#allocation6 + $0xb8] sm:$0xff]  ;;  %v99_v41 = vld [vmem:[#allocation6 + $0xc0] sm:$0xff] }
  0x1f   :  { %174 = vmatpush.msra.mxu1 %v116_v26  ;;  %155 = vmatpush.msra.mxu0 %v111_v29  ;;  %v100_v42 = vld [vmem:[#allocation6 + $0xc8] sm:$0xff]  ;;  %v93_v43 = vld [vmem:[#allocation6 + $0x90] sm:$0xff]  ;;  %v94_v44 = vld [vmem:[#allocation6 + $0x98] sm:$0xff] }
  0x20   :  { %196 = vmatpush.msra.mxu2 %v109_v27  ;;  %216 = vmatpush.msra.mxu3 %v110_v28  ;;  %v95_v45 = vld [vmem:[#allocation6 + $0xa0] sm:$0xff]  ;;  %v96_v46 = vld [vmem:[#allocation6 + $0xa8] sm:$0xff]  ;;  %v89_v47 = vld [vmem:[#allocation6 + $0x70] sm:$0xff] }
  0x21   :  { %175 = vmatpush.msra.mxu1 %v112_v30  ;;  %156 = vmatpush.msra.mxu0 %v107_v33  ;;  %v90_v48 = vld [vmem:[#allocation6 + $0x78] sm:$0xff]  ;;  %v91_v49 = vld [vmem:[#allocation6 + $0x80] sm:$0xff]  ;;  %v92_v50 = vld [vmem:[#allocation6 + $0x88] sm:$0xff] }
  0x22   :  { %197 = vmatpush.msra.mxu2 %v105_v31  ;;  %217 = vmatpush.msra.mxu3 %v106_v32  ;;  %v85_v51 = vld [vmem:[#allocation6 + $0x50] sm:$0xff]  ;;  %v86_v52 = vld [vmem:[#allocation6 + $0x58] sm:$0xff]  ;;  %v87_v53 = vld [vmem:[#allocation6 + $0x60] sm:$0xff] }
  0x23   :  { %176 = vmatpush.msra.mxu1 %v108_v34  ;;  %157 = vmatpush.msra.mxu0 %v103_v37  ;;  %v88_v54 = vld [vmem:[#allocation6 + $0x68] sm:$0xff]  ;;  %v81_v55 = vld [vmem:[#allocation6 + $0x30] sm:$0xff]  ;;  %v82_v56 = vld [vmem:[#allocation6 + $0x38] sm:$0xff] }
  0x24   :  { %198 = vmatpush.msra.mxu2 %v101_v35  ;;  %218 = vmatpush.msra.mxu3 %v102_v36  ;;  %v83_v57 = vld [vmem:[#allocation6 + $0x40] sm:$0xff]  ;;  %v84_v58 = vld [vmem:[#allocation6 + $0x48] sm:$0xff]  ;;  %v77_v59 = vld [vmem:[#allocation6 + $0x10] sm:$0xff] }
  0x25   :  { %177 = vmatpush.msra.mxu1 %v104_v38  ;;  %158 = vmatpush.msra.mxu0 %v99_v41  ;;  %v78_v60 = vld [vmem:[#allocation6 + $0x18] sm:$0xff]  ;;  %v79_v62 = vld [vmem:[#allocation6 + $0x20] sm:$0xff]  ;;  %v80_v63 = vld [vmem:[#allocation6 + $0x28] sm:$0xff] }
  0x26   :  { %199 = vmatpush.msra.mxu2 %v97_v39  ;;  %219 = vmatpush.msra.mxu3 %v98_v40  ;;  %v74_v61 = vld [vmem:[#allocation3] sm:$0xff]  ;;  %v75_v2 = vld [vmem:[#allocation6] sm:$0xff]  ;;  %v76_v3 = vld [vmem:[#allocation6 + $0x8] sm:$0xff] }
  0x27   :  { %178 = vmatpush.msra.mxu1 %v100_v42  ;;  %159 = vmatpush.msra.mxu0 %v95_v45  ;;  %v280_v0 = vld [vmem:[#allocation8 + $0x178] sm:$0xff]  ;;  %v279_v5 = vld [vmem:[#allocation8 + $0x170] sm:$0xff]  ;;  %v278_v9 = vld [vmem:[#allocation8 + $0x168] sm:$0xff] }
  0x28   :  { %200 = vmatpush.msra.mxu2 %v93_v43  ;;  %220 = vmatpush.msra.mxu3 %v94_v44  ;;  %v296_v1 = vld [vmem:[#allocation8 + $0x1f8] sm:$0xff]  ;;  %v295_v7 = vld [vmem:[#allocation8 + $0x1f0] sm:$0xff]  ;;  %v294_v11 = vld [vmem:[#allocation8 + $0x1e8] sm:$0xff] }
  0x29   :  { %179 = vmatpush.msra.mxu1 %v96_v46  ;;  %160 = vmatpush.msra.mxu0 %v91_v49  ;;  %v248_v4 = vld [vmem:[#allocation8 + $0x78] sm:$0xff]  ;;  %v247_v8 = vld [vmem:[#allocation8 + $0x70] sm:$0xff]  ;;  %v246_v12 = vld [vmem:[#allocation8 + $0x68] sm:$0xff] }
  0x2a   :  { %201 = vmatpush.msra.mxu2 %v89_v47  ;;  %221 = vmatpush.msra.mxu3 %v90_v48  ;;  %v264_v6 = vld [vmem:[#allocation8 + $0xf8] sm:$0xff]  ;;  %v263_v10 = vld [vmem:[#allocation8 + $0xf0] sm:$0xff]  ;;  %v277_v13 = vld [vmem:[#allocation8 + $0x160] sm:$0xff] }
  0x2b   :  { %180 = vmatpush.msra.mxu1 %v92_v50  ;;  %161 = vmatpush.msra.mxu0 %v87_v53  ;;  %v262_v14 = vld [vmem:[#allocation8 + $0xe8] sm:$0xff]  ;;  %v293_v15 = vld [vmem:[#allocation8 + $0x1e0] sm:$0xff]  ;;  %v276_v17 = vld [vmem:[#allocation8 + $0x158] sm:$0xff] }
  0x2c   :  { %202 = vmatpush.msra.mxu2 %v85_v51  ;;  %222 = vmatpush.msra.mxu3 %v86_v52  ;;  %v245_v16 = vld [vmem:[#allocation8 + $0x60] sm:$0xff]  ;;  %v292_v19 = vld [vmem:[#allocation8 + $0x1d8] sm:$0xff]  ;;  %v275_v21 = vld [vmem:[#allocation8 + $0x150] sm:$0xff] }
  0x2d   :  { %181 = vmatpush.msra.mxu1 %v88_v54  ;;  %162 = vmatpush.msra.mxu0 %v83_v57  ;;  %v261_v18 = vld [vmem:[#allocation8 + $0xe0] sm:$0xff]  ;;  %v244_v20 = vld [vmem:[#allocation8 + $0x58] sm:$0xff]  ;;  %v291_v23 = vld [vmem:[#allocation8 + $0x1d0] sm:$0xff] }
  0x2e   :  { %203 = vmatpush.msra.mxu2 %v81_v55  ;;  %223 = vmatpush.msra.mxu3 %v82_v56  ;;  %v260_v22 = vld [vmem:[#allocation8 + $0xd8] sm:$0xff]  ;;  %v243_v24 = vld [vmem:[#allocation8 + $0x50] sm:$0xff]  ;;  %v274_v25 = vld [vmem:[#allocation8 + $0x148] sm:$0xff] }
  0x2f   :  { %182 = vmatpush.msra.mxu1 %v84_v58  ;;  %163 = vmatpush.msra.mxu0 %v79_v62  ;;  %v259_v26 = vld [vmem:[#allocation8 + $0xd0] sm:$0xff]  ;;  %v290_v27 = vld [vmem:[#allocation8 + $0x1c8] sm:$0xff]  ;;  %v273_v29 = vld [vmem:[#allocation8 + $0x140] sm:$0xff] }
  0x30   :  { %204 = vmatpush.msra.mxu2 %v77_v59  ;;  %224 = vmatpush.msra.mxu3 %v78_v60  ;;  %v242_v28 = vld [vmem:[#allocation8 + $0x48] sm:$0xff]  ;;  %v289_v31 = vld [vmem:[#allocation8 + $0x1c0] sm:$0xff]  ;;  %v272_v33 = vld [vmem:[#allocation8 + $0x138] sm:$0xff] }
  0x31   :  { %205 = vmatmul.f32.vlgmr.msra.gmra.mxu2 %v74_v61  ;;  %225 = vmatmul.f32.vlgmr.msra.gmra.mxu3 %v74_v61  ;;  %v258_v30 = vld [vmem:[#allocation8 + $0xc8] sm:$0xff]  ;;  %v241_v32 = vld [vmem:[#allocation8 + $0x40] sm:$0xff]  ;;  %v288_v35 = vld [vmem:[#allocation8 + $0x1b8] sm:$0xff] }
  0x32   :  { %183 = vmatpush.msra.mxu1 %v80_v63  ;;  %341 = vmatpush.msrb.mxu2 %v280_v0  ;;  %v257_v34 = vld [vmem:[#allocation8 + $0xc0] sm:$0xff]  ;;  %v240_v36 = vld [vmem:[#allocation8 + $0x38] sm:$0xff]  ;;  %v271_v37 = vld [vmem:[#allocation8 + $0x130] sm:$0xff] }
  0x33   :  { %361 = vmatpush.msrb.mxu3 %v296_v1  ;;  %164 = vmatpush.msra.mxu0 %v75_v2  ;;  %v256_v38 = vld [vmem:[#allocation8 + $0xb8] sm:$0xff]  ;;  %v287_v39 = vld [vmem:[#allocation8 + $0x1b0] sm:$0xff]  ;;  %v270_v41 = vld [vmem:[#allocation8 + $0x128] sm:$0xff] }
  0x34   :  { %184 = vmatpush.msra.mxu1 %v76_v3  ;;  %165 = vmatmul.f32.vlgmr.msra.gmra.mxu0 %v74_v61  ;;  %v239_v40 = vld [vmem:[#allocation8 + $0x30] sm:$0xff]  ;;  %v286_v43 = vld [vmem:[#allocation8 + $0x1a8] sm:$0xff]  ;;  %v269_v45 = vld [vmem:[#allocation8 + $0x120] sm:$0xff] }
  0x35   :  { %185 = vmatmul.f32.vlgmr.msra.gmra.mxu1 %v74_v61  ;;  %301 = vmatpush.msrb.mxu0 %v248_v4  ;;  %v255_v42 = vld [vmem:[#allocation8 + $0xb0] sm:$0xff]  ;;  %v238_v44 = vld [vmem:[#allocation8 + $0x28] sm:$0xff]  ;;  %v285_v47 = vld [vmem:[#allocation8 + $0x1a0] sm:$0xff] }
  0x36   :  { %342 = vmatpush.msrb.mxu2 %v279_v5  ;;  %321 = vmatpush.msrb.mxu1 %v264_v6  ;;  %v254_v46 = vld [vmem:[#allocation8 + $0xa8] sm:$0xff]  ;;  %v237_v48 = vld [vmem:[#allocation8 + $0x20] sm:$0xff]  ;;  %v268_v49 = vld [vmem:[#allocation8 + $0x118] sm:$0xff] }
  0x37   :  { %362 = vmatpush.msrb.mxu3 %v295_v7  ;;  %302 = vmatpush.msrb.mxu0 %v247_v8  ;;  %v236_v50 = vld [vmem:[#allocation8 + $0x18] sm:$0xff]  ;;  %v253_v51 = vld [vmem:[#allocation8 + $0xa0] sm:$0xff]  ;;  %v267_v52 = vld [vmem:[#allocation8 + $0x110] sm:$0xff] }
  0x38   :  { %343 = vmatpush.msrb.mxu2 %v278_v9  ;;  %322 = vmatpush.msrb.mxu1 %v263_v10  ;;  %v284_v53 = vld [vmem:[#allocation8 + $0x198] sm:$0xff]  ;;  %v235_v54 = vld [vmem:[#allocation8 + $0x10] sm:$0xff]  ;;  %v266_v56 = vld [vmem:[#allocation8 + $0x108] sm:$0xff] }
  0x39   :  { %363 = vmatpush.msrb.mxu3 %v294_v11  ;;  %303 = vmatpush.msrb.mxu0 %v246_v12  ;;  %v252_v55 = vld [vmem:[#allocation8 + $0x98] sm:$0xff]  ;;  %v283_v57 = vld [vmem:[#allocation8 + $0x190] sm:$0xff]  ;;  %v234_v58 = vld [vmem:[#allocation8 + $0x8] sm:$0xff] }
  0x3a   :  { %344 = vmatpush.msrb.mxu2 %v277_v13  ;;  %323 = vmatpush.msrb.mxu1 %v262_v14  ;;  %v251_v59 = vld [vmem:[#allocation8 + $0x90] sm:$0xff]  ;;  %v265_v60 = vld [vmem:[#allocation8 + $0x100] sm:$0xff]  ;;  %v282_v61 = vld [vmem:[#allocation8 + $0x188] sm:$0xff] }
  0x3b   :  { %364 = vmatpush.msrb.mxu3 %v293_v15  ;;  %304 = vmatpush.msrb.mxu0 %v245_v16  ;;  %v233_v62 = vld [vmem:[#allocation8] sm:$0xff]  ;;  %v250_v63 = vld [vmem:[#allocation8 + $0x88] sm:$0xff]  ;;  %v139_v2 = vld [vmem:[%s627_s2] sm:$0xf] }
  0x3c   :  { %345 = vmatpush.msrb.mxu2 %v276_v17  ;;  %324 = vmatpush.msrb.mxu1 %v261_v18  ;;  %v281_v0 = vld [vmem:[#allocation8 + $0x180] sm:$0xff]  ;;  %v141_v3 = vperm.slane %v139_v2, 0  ;;  %v142_v4 = vperm.slane %v139_v2, 1  ;;  %v143_v5 = vperm.slane %v139_v2, 2  ;;  %v144_v6 = vperm.slane %v139_v2, 3 }
  0x3d   :  { %365 = vmatpush.msrb.mxu3 %v292_v19  ;;  %305 = vmatpush.msrb.mxu0 %v244_v20  ;;  %v249_v1 = vld [vmem:[#allocation8 + $0x80] sm:$0xff]  ;;  %v383_v19 = vld [vmem:[#allocation2] sm:$0x1]  ;;  %v559_v20 = vmov 0  }
  0x3e   :  { %346 = vmatpush.msrb.mxu2 %v275_v21  ;;  %325 = vmatpush.msrb.mxu1 %v260_v22  ;;  %v445_v21 = vld [vmem:[%s629_s4] ss:$0 sm:$0xff]  ;;  %s560_s4 = smov [#allocation9]  }
  0x3f   :  { %366 = vmatpush.msrb.mxu3 %v291_v23  ;;  %306 = vmatpush.msrb.mxu0 %v243_v24  ;;  %s422_s23 = sshll.u32 %s560_s4, 4  ;;  %s423_s23 = int_to_ptr.vmem [resolvable:$true] %s422_s23 }
  0x40   :  { %347 = vmatpush.msrb.mxu2 %v274_v25  ;;  %326 = vmatpush.msrb.mxu1 %v259_v26 }
  0x41   :  { %367 = vmatpush.msrb.mxu3 %v290_v27  ;;  %307 = vmatpush.msrb.mxu0 %v242_v28 }
  0x42   :  { %348 = vmatpush.msrb.mxu2 %v273_v29  ;;  %327 = vmatpush.msrb.mxu1 %v258_v30 }
  0x43   :  { %368 = vmatpush.msrb.mxu3 %v289_v31  ;;  %308 = vmatpush.msrb.mxu0 %v241_v32  ;;  %v382_v31 = vld [vmem:[%s630_s5] sm:$0x1] }
  0x44   :  { %349 = vmatpush.msrb.mxu2 %v272_v33  ;;  %328 = vmatpush.msrb.mxu1 %v257_v34 }
  0x45   :  { %369 = vmatpush.msrb.mxu3 %v288_v35  ;;  %309 = vmatpush.msrb.mxu0 %v240_v36 }
  0x46   :  { %350 = vmatpush.msrb.mxu2 %v271_v37  ;;  %329 = vmatpush.msrb.mxu1 %v256_v38 }
  0x47   :  { %370 = vmatpush.msrb.mxu3 %v287_v39  ;;  %310 = vmatpush.msrb.mxu0 %v239_v40 }
  0x48   :  { %351 = vmatpush.msrb.mxu2 %v270_v41  ;;  %330 = vmatpush.msrb.mxu1 %v255_v42 }
  0x49   :  { %371 = vmatpush.msrb.mxu3 %v286_v43  ;;  %311 = vmatpush.msrb.mxu0 %v238_v44 }
  0x4a   :  { %352 = vmatpush.msrb.mxu2 %v269_v45  ;;  %331 = vmatpush.msrb.mxu1 %v254_v46 }
  0x4b   :  { %372 = vmatpush.msrb.mxu3 %v285_v47  ;;  %312 = vmatpush.msrb.mxu0 %v237_v48 }
  0x4c   :  { %353 = vmatpush.msrb.mxu2 %v268_v49  ;;  %332 = vmatpush.msrb.mxu1 %v253_v51 }
  0x4d   :  { %313 = vmatpush.msrb.mxu0 %v236_v50  ;;  %373 = vmatpush.msrb.mxu3 %v284_v53 }
  0x4e   :  { %354 = vmatpush.msrb.mxu2 %v267_v52  ;;  %333 = vmatpush.msrb.mxu1 %v252_v55 }
  0x4f   :  { %314 = vmatpush.msrb.mxu0 %v235_v54  ;;  %374 = vmatpush.msrb.mxu3 %v283_v57 }
  0x50   :  { %355 = vmatpush.msrb.mxu2 %v266_v56  ;;  %334 = vmatpush.msrb.mxu1 %v251_v59 }
  0x51   :  { %315 = vmatpush.msrb.mxu0 %v234_v58  ;;  %375 = vmatpush.msrb.mxu3 %v282_v61 }
  0x52   :  { %356 = vmatpush.msrb.mxu2 %v265_v60  ;;  %335 = vmatpush.msrb.mxu1 %v250_v63 }
  0x53   :  { %316 = vmatpush.msrb.mxu0 %v233_v62  ;;  %376 = vmatpush.msrb.mxu3 %v281_v0 }
  0x54   :  { %336 = vmatpush.msrb.mxu1 %v249_v1  ;;  %444 = vset.pattern.permute.xlu0 %v559_v20 }
  0x55   :  { %386 = vperm.xlu0 %444, %v383_v19  }
  0xb1   :  { %v166_v7 = vpop.f32.mrf.mxu0 }
  0xb2   :  { %v186_v8 = vpop.f32.mrf.mxu1  ;;  %v167_v9 = vadd.f32 %v166_v7, %v141_v3 }
  0xb3   :  { %v187_v10 = vadd.f32 %v186_v8, %v142_v4 }
  0xb4   :  { %v206_v11 = vpop.f32.mrf.mxu2  ;;  %v226_v12 = vpop.f32.mrf.mxu3  ;;  %v229_v14 = vmax.f32 %v167_v9, 0.0 }
  0xb5   :  { %v207_v13 = vadd.f32 %v206_v11, %v143_v5  ;;  %v227_v15 = vadd.f32 %v226_v12, %v144_v6  ;;  %v230_v16 = vmax.f32 %v187_v10, 0.0 }
  0xb6   :  { %317 = vmatmul.f32.vlgmr.msrb.gmra.mxu0 %v229_v14 }
  0xb7   :  { %v231_v17 = vmax.f32 %v207_v13, 0.0  ;;  %v232_v18 = vmax.f32 %v227_v15, 0.0  ;;  %337 = vmatmul.f32.vlgmr.msrb.gmra.mxu1 %v230_v16 }
  0xb9   :  { %357 = vmatmul.f32.vlgmr.msrb.gmra.mxu2 %v231_v17  ;;  %377 = vmatmul.f32.vlgmr.msrb.gmra.mxu3 %v232_v18 }
  0xc7   :  { %v387_v32 = vpop.permute.xlu0 %386 }
  0xc8   :  { %v389_v33 = vperm.slane %v387_v32, 0 }
 0x133   :  { %v318_v22 = vpop.f32.mrf.mxu0 }
 0x134   :  { %v319_v23 = vadd.f32 %v445_v21, %v318_v22  ;;  %v338_v24 = vpop.f32.mrf.mxu1 }
 0x136   :  { %v339_v25 = vadd.f32 %v338_v24, %v319_v23 }
 0x13c   :  { %v358_v26 = vpop.f32.mrf.mxu2  ;;  %v378_v27 = vpop.f32.mrf.mxu3 }
 0x13d   :  { %v359_v28 = vadd.f32 %v358_v26, %v339_v25 }
 0x13f   :  { %v379_v29 = vadd.f32 %v378_v27, %v359_v28 }
 0x141   :  { %v381_v30 = vmax.f32 %v379_v29, 0.0 }
 0x143   :  { %405 = vmatpush.xpose.msra.mxu0 %v381_v30 }
 0x146   :  { %406 = vmatmul.f32.vlgmr.msra.gmra.mxu0 %v382_v31 }
 0x1c3   :  { %v407_v34 = vpop.f32.mrf.mxu0 }
 0x1c4   :  { %v408_v35 = vadd.f32 %v407_v34, %v389_v33 }
 0x1c6   :  { %v410_v36 = vsub.f32 0.0, %v408_v35 }
 0x1c8   :  { %v411_v37 = vmul.f32 1.442695, %v410_v36 }
 0x1ca   :  { %446 = vpow2.f32 %v411_v37 }
 0x1d0   :  { %v447_v38 = vpop.eup %446 }
 0x1d1   :  { %v413_v39 = vadd.f32 1.0, %v447_v38 }
 0x1d3   :  { %448 = vrcp.f32 %v413_v39 }
 0x1d9   :  { %v449_v40 = vpop.eup %448 }
 0x1da   :  { %416 = vst.msk [vmem:[#allocation9] sm:$0x1] %vm415_vm0, %v449_v40 }
 0x1db   :  { %427 = dma.vmem_to_hbm [thread:$0]  %s423_s23, 16, %s425_s26, [#allocation5]  }
 0x1dc   :  { %550 = dma.done.wait [#allocation5], 16  }
 0x1dd   :  { %551 = vsyncadd [#allocation5], 4294967280 }
 0x1de   :  { %432 = vsyncpa [#allocation4], 1 }
 0x1df   :  { %433 = vsyncpa [#allocation7], 1 }
 0x1e0   :  { %434 = vsyncpa [#allocation5], 1 }

</bundles_post_ra>
